<compile_context>
chip_gen: v6e
topology: v6e:2x2x1
jax: 0.10.0
libtpu: 0.0.40
codegen_flags: <defaults>
</compile_context>

<pallas_src>
import jax
import jax.numpy as jnp
from jax.experimental import pallas as pl
from jax.experimental.pallas import tpu as pltpu


# ------------------------------ configuration -------------------------------

_MIB = 2 ** 20
_VMEM_BUDGET_BYTES = 28 * _MIB   # target working set (fits all generations' scoped VMEM)
_VMEM_LIMIT_BYTES = 40 * _MIB    # explicit scoped-VMEM limit handed to Mosaic
_MIN_ROWS_PER_TC = 256           # below this, don't split the batch just for v7x's 2nd TC
_K_TILE_MAX = 512                # max contraction tile for the nonlinear first matmul


# ------------------------------ small helpers -------------------------------

def _round_up(n, m):
    return ((n + m - 1) // m) * m


def _cdiv(a, b):
    return -(-a // b)


def _sublane_granule(dtype):
    # f32 -> 8 rows per sublane tile, bf16 -> 16 (sub-32-bit packs along sublanes).
    return max(8, 8 * 4 // jnp.dtype(dtype).itemsize)


def _pick_tb(batch, tb, granule, fixed_bytes, per_row_bytes):
    """Pick a batch tile: granule-aligned, VMEM-budgeted, balanced across steps."""
    tb = max(granule, _round_up(min(tb, batch), granule))
    # Keep double-buffered tiles + resident weights under the VMEM budget.
    while tb > granule and fixed_bytes + tb * per_row_bytes > _VMEM_BUDGET_BYTES:
        tb = max(granule, _round_up(tb // 2, granule))
    nsteps = _cdiv(batch, tb)
    # v7x has 2 TensorCores per chip: give both cores work when the batch is large.
    if nsteps == 1 and batch >= 2 * _MIN_ROWS_PER_TC:
        nsteps = 2
    # Balance tiles so the ragged last block wastes little compute.
    tb = _round_up(_cdiv(batch, nsteps), granule)
    if tb >= batch:
        tb = batch  # single full-extent block is always a legal block shape
    return tb


def _pick_tk(feature_dim):
    """Contraction tile for x @ W1 in the nonlinear path."""
    if feature_dim <= 1024:
        return feature_dim           # single K step; W1 fully resident
    # K tiles must divide F exactly (ragged K blocks would pollute the accumulator).
    for tk in range(_K_TILE_MAX, 0, -128):
        if feature_dim % tk == 0:
            return tk
    # TODO(synk): zero-pad K on the host for huge, non-128-divisible feature dims.
    return feature_dim


# ----------------------------- Pallas kernels --------------------------------

def _linear_kernel(x_ref, w_ref, o_ref):
    # y = x @ W1_t   (f32 accumulation on the MXU)
    o_ref[...] = jnp.dot(
        x_ref[...], w_ref[...], preferred_element_type=jnp.float32
    ).astype(o_ref.dtype)


def _nonlinear_kernel(x_ref, w1_ref, b1_ref, w2_ref, o_ref, acc_ref):
    # acc = x @ W1_t (tiled over K);  h = SiLU(acc + b1);  y = h @ W2_t
    k = pl.program_id(1)

    @pl.when(k == 0)
    def _init():
        acc_ref[...] = jnp.zeros_like(acc_ref)

    acc_ref[...] += jnp.dot(
        x_ref[...], w1_ref[...], preferred_element_type=jnp.float32)

    @pl.when(k == pl.num_programs(1) - 1)
    def _finish():
        h = acc_ref[...] + b1_ref[...]        # f32 bias add
        h = h * jax.nn.sigmoid(h)             # SiLU in f32 (EUP handles sigmoid)
        o_ref[...] = jnp.dot(
            h.astype(w2_ref.dtype), w2_ref[...], preferred_element_type=jnp.float32
        ).astype(o_ref.dtype)


# ------------------------------ host wrappers --------------------------------

def biometric_projector_linear(x, w1_t, *, tb=1024, compute_dtype=jnp.bfloat16):
    """is_linear=True path.  x: [B, F], w1_t: [F, P] (PyTorch fc1.weight.T) -> [B, P]."""
    B, F = x.shape
    Fw, P = w1_t.shape
    assert Fw == F, "w1_t must be [feature_dim, projected_dim]"

    out_dtype = x.dtype
    cb = jnp.dtype(compute_dtype).itemsize
    ob = jnp.dtype(out_dtype).itemsize
    granule = _sublane_granule(compute_dtype)

    fixed = 2 * F * P * cb                 # double-buffered resident weight
    per_row = 2 * F * cb + 2 * P * ob      # double-buffered x / y tiles
    TB = _pick_tb(B, tb, granule, fixed, per_row)
    grid_b = _cdiv(B, TB)

    cost = pl.CostEstimate(
        flops=int(2 * B * F * P),
        transcendentals=0,
        bytes_accessed=int(B * F * cb + F * P * cb + B * P * ob))

    return pl.pallas_call(
        _linear_kernel,
        out_shape=jax.ShapeDtypeStruct((B, P), out_dtype),
        grid_spec=pltpu.PrefetchScalarGridSpec(
            num_scalar_prefetch=0,
            grid=(grid_b,),
            in_specs=[
                pl.BlockSpec((TB, F), lambda i: (i, 0)),   # x: tiled over batch
                pl.BlockSpec((F, P), lambda i: (0, 0)),    # W1: resident
            ],
            out_specs=pl.BlockSpec((TB, P), lambda i: (i, 0)),
        ),
        compiler_params=pltpu.CompilerParams(
            dimension_semantics=("parallel",),
            vmem_limit_bytes=_VMEM_LIMIT_BYTES),
        cost_estimate=cost,
    )(x.astype(compute_dtype), w1_t.astype(compute_dtype))


def biometric_projector_nonlinear(x, w1_t, b1, w2_t, *, tb=1024,
                                  compute_dtype=jnp.bfloat16):
    """is_linear=False path.
    x: [B, F], w1_t: [F, F] (fc1.weight.T), b1: [F] or [1, F] (f32),
    w2_t: [F, P] (fc2.weight.T) -> [B, P]."""
    B, F = x.shape
    assert w1_t.shape == (F, F)
    Fw, P = w2_t.shape
    assert Fw == F
    b1 = jnp.asarray(b1, jnp.float32).reshape(1, F)   # bias stays f32

    out_dtype = x.dtype
    cb = jnp.dtype(compute_dtype).itemsize
    ob = jnp.dtype(out_dtype).itemsize
    granule = _sublane_granule(compute_dtype)

    TK = _pick_tk(F)
    nk = F // TK if F % TK == 0 else 1
    if nk == 1:
        TK = F

    fixed = 2 * TK * F * cb + 2 * F * 4 + 2 * F * P * cb   # W1 tile, b1, W2 (dbl-buffered)
    per_row = 2 * TK * cb + 2 * P * ob + F * 4             # x tile, y tile, f32 accumulator
    TB = _pick_tb(B, tb, granule, fixed, per_row)
    grid_b = _cdiv(B, TB)

    cost = pl.CostEstimate(
        flops=int(2 * B * F * F + 2 * B * F * P + 4 * B * F),
        transcendentals=int(B * F),
        bytes_accessed=int(B * F * cb + F * F * cb + F * 4 + F * P * cb + B * P * ob))

    return pl.pallas_call(
        _nonlinear_kernel,
        out_shape=jax.ShapeDtypeStruct((B, P), out_dtype),
        grid_spec=pltpu.PrefetchScalarGridSpec(
            num_scalar_prefetch=0,
            grid=(grid_b, nk),
            in_specs=[
                pl.BlockSpec((TB, TK), lambda i, k: (i, k)),  # x: batch x K tiles
                pl.BlockSpec((TK, F), lambda i, k: (k, 0)),   # W1: K-tiled (resident if nk==1)
                pl.BlockSpec((1, F), lambda i, k: (0, 0)),    # b1: resident (f32)
                pl.BlockSpec((F, P), lambda i, k: (0, 0)),    # W2: resident
            ],
            out_specs=pl.BlockSpec((TB, P), lambda i, k: (i, 0)),
            scratch_shapes=[pltpu.VMEM((TB, F), jnp.float32)],
        ),
        compiler_params=pltpu.CompilerParams(
            dimension_semantics=("parallel", "arbitrary"),
            vmem_limit_bytes=_VMEM_LIMIT_BYTES),
        cost_estimate=cost,
    )(x.astype(compute_dtype), w1_t.astype(compute_dtype), b1,
      w2_t.astype(compute_dtype))


# --------------------------------- driver ------------------------------------

if __name__ == "__main__":
    key = jax.random.PRNGKey(0)
    k_x, k_w1l, k_w1n, k_b1, k_w2 = jax.random.split(key, 5)

    batch = 8
    feature_dim = 32
    projected_dim = 16

    x = jax.random.normal(k_x, (batch, feature_dim), dtype=jnp.float32)

    def uniform_init(k, shape, fan_in):
        bound = 1.0 / jnp.sqrt(fan_in)
        return jax.random.uniform(k, shape, jnp.float32, -bound, bound)

    # Weights stored pre-transposed (PyTorch Linear weight is [out, in]; we use [in, out]).
    w1_lin_t = uniform_init(k_w1l, (feature_dim, projected_dim), feature_dim)
    w1_nl_t = uniform_init(k_w1n, (feature_dim, feature_dim), feature_dim)
    b1 = uniform_init(k_b1, (1, feature_dim), feature_dim)
    w2_t = uniform_init(k_w2, (feature_dim, projected_dim), feature_dim)

    def check(got, want, name, atol=2e-2, rtol=2e-2):
        assert got.shape == want.shape, f"{name}: shape {got.shape} vs {want.shape}"
        assert jnp.allclose(got, want, atol=atol, rtol=rtol), f"{name}: mismatch"

    # ---- linear path, f32 compute (exact PyTorch math) ----
    y_lin_f32 = jax.block_until_ready(
        biometric_projector_linear(x, w1_lin_t, compute_dtype=jnp.float32))
    check(y_lin_f32, x @ w1_lin_t, "linear/f32")

    # ---- linear path, bf16 compute (default) ----
    y_lin_bf16 = jax.block_until_ready(biometric_projector_linear(x, w1_lin_t))
    cd = jnp.bfloat16
    y_lin_ref = jnp.dot(x.astype(cd), w1_lin_t.astype(cd),
                        preferred_element_type=jnp.float32).astype(x.dtype)
    check(y_lin_bf16, y_lin_ref, "linear/bf16")

    # ---- nonlinear path, f32 compute ----
    y_nl_f32 = jax.block_until_ready(
        biometric_projector_nonlinear(x, w1_nl_t, b1, w2_t, compute_dtype=jnp.float32))
    h_ref = x @ w1_nl_t + b1
    h_ref = h_ref * jax.nn.sigmoid(h_ref)
    check(y_nl_f32, h_ref @ w2_t, "nonlinear/f32")

    # ---- nonlinear path, bf16 compute (default) ----
    y_nl_bf16 = jax.block_until_ready(
        biometric_projector_nonlinear(x, w1_nl_t, b1, w2_t))
    h_b = jnp.dot(x.astype(cd), w1_nl_t.astype(cd),
                  preferred_element_type=jnp.float32) + b1
    h_b = h_b * jax.nn.sigmoid(h_b)
    y_nl_ref = jnp.dot(h_b.astype(cd), w2_t.astype(cd),
                       preferred_element_type=jnp.float32).astype(x.dtype)
    check(y_nl_bf16, y_nl_ref, "nonlinear/bf16")

    print("KERNEL_OK")
</pallas_src>

<mosaic_0001>
module attributes {stable_mosaic.version = 11 : i64} {
  func.func @_linear_kernel(%arg0: i32, %arg1: memref<8x32xf32, #tpu.memory_space<vmem>>, %arg2: memref<32x16xf32, #tpu.memory_space<vmem>>, %arg3: memref<8x16xf32, #tpu.memory_space<vmem>>) attributes {dimension_semantics = [#tpu.dimension_semantics<parallel>], iteration_bounds = array<i64: 1>, scalar_prefetch = 0 : i64, scratch_operands = 0 : i64, tpu.core_type = #tpu.core_type<tc>, window_params = [{transform_indices = @transform_0, window_bounds = array<i64: 8, 32>}, {pipeline_mode = #tpu.pipeline_mode<synchronous>, transform_indices = @transform_1, window_bounds = array<i64: 32, 16>}, {transform_indices = @transform_2, window_bounds = array<i64: 8, 16>}]} {
    %c0 = arith.constant 0 : index
    %c0_0 = arith.constant 0 : index
    %0 = vector.load %arg1[%c0, %c0_0] : memref<8x32xf32, #tpu.memory_space<vmem>>, vector<8x32xf32>
    %c0_1 = arith.constant 0 : index
    %c0_2 = arith.constant 0 : index
    %1 = vector.load %arg2[%c0_1, %c0_2] : memref<32x16xf32, #tpu.memory_space<vmem>>, vector<32x16xf32>
    %cst = arith.constant dense<0.000000e+00> : vector<8x16xf32>
    %2 = tpu.matmul %0, %1, %cst {dimension_numbers = #tpu.dot_dimension_numbers<[1], [0], [0], [1], [0, 0, 1, 1], [], []>} : vector<8x32xf32>, vector<32x16xf32>, vector<8x16xf32> -> vector<8x16xf32>
    %c0_3 = arith.constant 0 : index
    %c0_4 = arith.constant 0 : index
    %3 = vector.load %arg3[%c0_3, %c0_4] : memref<8x16xf32, #tpu.memory_space<vmem>>, vector<8x16xf32>
    tpu.vector_store %arg3[%c0_3, %c0_4], %2 {strides = array<i32>} : memref<8x16xf32, #tpu.memory_space<vmem>>, vector<8x16xf32>,
    return
  }
  func.func @transform_0(%arg0: i32) -> (i32, i32) {
    %c0_i32 = arith.constant 0 : i32
    %c0_i32_0 = arith.constant 0 : i32
    return %arg0, %c0_i32 : i32, i32
  }
  func.func @transform_1(%arg0: i32) -> (i32, i32) {
    %c0_i32 = arith.constant 0 : i32
    %c0_i32_0 = arith.constant 0 : i32
    %c0_i32_1 = arith.constant 0 : i32
    return %c0_i32, %c0_i32_0 : i32, i32
  }
  func.func @transform_2(%arg0: i32) -> (i32, i32) {
    %c0_i32 = arith.constant 0 : i32
    %c0_i32_0 = arith.constant 0 : i32
    return %arg0, %c0_i32 : i32, i32
  }
}

</mosaic_0001>

<bundles_post_ra>
// kernel: tpu_custom_call.1
= control target key start
LH: loop header
LB: loop body
LE: loop exit
PB: predicated region body
PF: predicated region fallthrough
CT: control target
= control target key end

     0   :  { %v149_v1 = vmov 0.0   ;;  %vm150_vm0 = vmmov 0   ;;  %s185_s0 = inlined_call_operand.vmem [shape: f32[8,32], index: 0, kind: input, shape index: {}]   ;;  %s186_s1 = inlined_call_operand.vmem [shape: f32[32,16], index: 1, kind: input, shape index: {}]   ;;  %s187_s2 = inlined_call_operand.hbm [shape: f32[8,16], index: 2, kind: output, shape index: {}]  }
   0x1   :  { %v16_v0 = vld [vmem:[%s186_s1 + $0x18] sm:$0xff]  ;;  %113 = vmatprep.subr.mxu0 %v149_v1  ;;  %v15_v2 = vld [vmem:[%s186_s1 + $0x10] sm:$0xff]  ;;  %121 = vmatprep.mubr.msk.f32.mxu0 %vm150_vm0, %v149_v1 }
   0x2   :  { %7 = vsyncpa [#allocation3], 0  ;;  %114 = vmatpush3.msra.mxu0 %v16_v0  ;;  %v14_v3 = vld [vmem:[%s186_s1 + $0x8] sm:$0xff]  ;;  %v13_v4 = vld [vmem:[%s186_s1] sm:$0xff]  ;;  %vm17_vm1 = vcmask 261120   ;;  %s151_s19 = smov [#allocation2]  }
   0x3   :  { %115 = vmatprep.subr.mxu0 %v149_v1  ;;  %v12_v5 = vld [vmem:[%s185_s0] sm:$0xff]  ;;  %s99_s20 = sshll.u32 %s151_s19, 4  ;;  %vm91_vm2 = vcmask 130048   ;;  %s100_s20 = int_to_ptr.vmem [resolvable:$true] %s99_s20 }
   0x4   :  { %116 = vmatpush3.msra.mxu0 %v15_v2  ;;  %s127_s21 = scalar_lea.vmem %s100_s20, 128  ;;  %p132_p1 = scmp.lt.s32.totalorder %s100_s20, %s100_s20 }
   0x5   :  { %117 = vmatprep.subr.mxu0 %v149_v1  ;;  %p128_p0 = scmp.ne.s32.totalorder %s100_s20, %s127_s21  ;;  %p133_p2 = scmp.lt.s32.totalorder %s127_s21, %s127_s21 }
   0x6   :  { %118 = vmatpush3.msra.mxu0 %v14_v3 }
   0x7   :  { %119 = vmatprep.subr.mxu0 %v149_v1  ;;  %p134_p3 = por %p133_p2, %p132_p1 }
   0x8   :  { %120 = vmatpush3.msra.mxu0 %v13_v4 }
   0x9   :  { %122 = vmatmul.mubr.msk.f32.vlgmr.msra.gmra.mxu0 %vm17_vm1, %v12_v5  ;;  %p135_p4 = pnand %p134_p3, %p128_p0 }
  0xc9   :  { %v87_v6 = vpop.f32.mrf.mxu0 }
  0xca   :  { %92 = vst.msk [vmem:[#allocation2] sm:$0xff] %vm91_vm2, %v87_v6 }
  0xcb   :  { %v123_v7 = vpop.f32.mrf.mxu0 }
  0xcc   :  { %138 = shalt.err (!%p135_p4)
}
  0xcd   :  { %102 = dma.vmem_to_hbm [thread:$0]  %s100_s20, 128, %s187_s2, [#allocation3]  }
  0xce   :  { %147 = dma.done.wait [#allocation3], 128  }
  0xcf   :  { %148 = vsyncadd [#allocation3], 4294967168 }
  0xd0   :  { %106 = vsyncpa [#allocation3], 1 }

</bundles_post_ra>
